<compile_context>
chip_gen: v7x
topology: tpu7x:2x2x1
jax: 0.10.0
libtpu: 0.0.40
codegen_flags: <defaults>
</compile_context>

<pallas_src>
import functools

import numpy as np

import jax
import jax.numpy as jnp
from jax.experimental import pallas as pl
from jax.experimental.pallas import tpu as pltpu


# ----------------------------------------------------------------------------
# Pallas kernel: whole StrideNet forward for one batch tile.
# ----------------------------------------------------------------------------
def stridenet_kernel(*refs, n_blocks, inflation, frame_counts, b_tile):
    x_ref, invm_ref, bsel_ref, psum_ref = refs[0:4]
    mult_refs = refs[4:4 + n_blocks]
    (we_ref, be_ref, ws_ref, bs_ref, wm_ref, bm_ref,
     wa_ref, ba_ref, wb_ref, bb_ref, out_ref, h_ref) = refs[4 + n_blocks:]

    s = inflation
    bt = b_tile
    L = frame_counts[0]

    x = x_ref[...]                                            # (BT*L, Cin)

    # per-batch mean over frames:  (sum of each batch's L rows) / sum(mask)
    mean = jnp.dot(psum_ref[...], x,
                   preferred_element_type=jnp.float32) * invm_ref[...]  # (BT,Cin)
    xc = x - jnp.dot(bsel_ref[...], mean,
                     preferred_element_type=jnp.float32)      # (BT*L, Cin)

    # expand conv (1x1, BN scale folded into the weights) + shift + ReLU
    h = jnp.maximum(
        jnp.dot(xc, we_ref[...], preferred_element_type=jnp.float32)
        + be_ref[...], 0.0)                                   # (BT*L, C)
    h_ref[...] = h                                            # -> VMEM scratch

    for k in range(n_blocks):
        L_cur = frame_counts[k]
        L_out = frame_counts[k + 1]
        M = bt * L_out

        if L_cur == s * L_out:
            # kernel==stride==3 -> non-overlapping windows: tap j of every
            # window is a single strided row-load over the whole batch tile.
            taps = [h_ref[pl.ds(j, M, stride=s), :] for j in range(3)]
        else:
            # TODO(synk): general-inflation fallback gathers per batch element.
            taps = [
                jnp.concatenate(
                    [h_ref[pl.ds(b * L_cur + j, L_out, stride=s), :]
                     for b in range(bt)], axis=0)
                for j in range(3)]

        # strided conv (kernel=3) as 3 matmuls; BN scale already folded in.
        acc = (jnp.dot(taps[0], ws_ref[k, 0], preferred_element_type=jnp.float32)
               + jnp.dot(taps[1], ws_ref[k, 1], preferred_element_type=jnp.float32)
               + jnp.dot(taps[2], ws_ref[k, 2], preferred_element_type=jnp.float32))
        acc = acc * mult_refs[k][...]                         # mask multiplier (M,1)
        hs = jnp.maximum(acc + bs_ref[k], 0.0)                # stride BN shift+ReLU

        # smooth conv (1x1) + BN shift + ReLU
        hm = jnp.dot(hs, wm_ref[k], preferred_element_type=jnp.float32)
        hm = jnp.maximum(hm + bm_ref[k], 0.0)

        h = hm + taps[1]                                      # residual = frames 1::s
        h_ref[0:M, :] = h

    # frames collapsed to 1: h is (BT, C)
    a = jnp.maximum(
        jnp.dot(h, wa_ref[...], preferred_element_type=jnp.float32)
        + ba_ref[...], 0.0)
    y = (jnp.dot(a, wb_ref[...], preferred_element_type=jnp.float32)
         + bb_ref[...] + mean)
    out_ref[...] = y                                          # (BT, Cin)


# ----------------------------------------------------------------------------
# Wrapper: layout plumbing, mask precompute, BN folding, pallas_call.
# Takes inputs/params in the original torch (NCL) layout.
# ----------------------------------------------------------------------------
def stridenet_forward(x_ncl, mask_n1l, tp, *, n_blocks, inflation,
                      max_batch_tile=64):
    B, Cin, L = x_ncl.shape
    s = inflation
    C = tp["w_expand_t"].shape[0]

    # frame counts after each strided conv; must collapse to a single frame.
    frame_counts = [L]
    for _ in range(n_blocks):
        frame_counts.append((frame_counts[-1] - 3) // s + 1)
    assert frame_counts[-1] == 1, "n_frames must collapse to 1 after n_blocks"
    for k in range(n_blocks):
        # torch residual x[:, :, 1::s] must match the strided-conv output len.
        assert -((1 - frame_counts[k]) // s) == frame_counts[k + 1], \
            "residual length mismatch for this (n_frames, inflation)"

    # ---- batch tiling / padding -------------------------------------------
    if B <= max_batch_tile:
        b_tile, B_pad = B, B                       # single grid step, full blocks
    else:
        b_tile = max_batch_tile                    # multiple of 8 -> aligned blocks
        B_pad = ((B + b_tile - 1) // b_tile) * b_tile

    x_blc = jnp.transpose(x_ncl, (0, 2, 1)).astype(jnp.float32)   # (B, L, Cin)
    mask_bl = jnp.transpose(mask_n1l, (0, 2, 1))[:, :, 0].astype(jnp.float32)
    if B_pad > B:
        x_blc = jnp.pad(x_blc, ((0, B_pad - B), (0, 0), (0, 0)))
        mask_bl = jnp.pad(mask_bl, ((0, B_pad - B), (0, 0)), constant_values=1.0)

    x2d = x_blc.reshape(B_pad * L, Cin)

    # ---- mask-only precompute (depends only on the mask, not on x) --------
    invm = (1.0 / jnp.sum(mask_bl, axis=1, keepdims=True)).astype(jnp.float32)
    mults = []
    m = mask_bl
    for k in range(n_blocks):
        Lo = frame_counts[k + 1]
        idx = jnp.arange(Lo) * s
        sm = m[:, idx] + m[:, idx + 1] + m[:, idx + 2]            # (B_pad, Lo)
        m_new = (sm != 0.0).astype(jnp.float32)
        mults.append((3.0 / (sm + 1e-6) * m_new).reshape(B_pad * Lo, 1))
        m = m_new

    # ---- constant per-tile pooling matrices (rows <-> batch) ---------------
    rows = np.arange(b_tile * L)
    sel = np.zeros((b_tile * L, b_tile), np.float32)
    sel[rows, rows // L] = 1.0
    S = jnp.asarray(sel)                     # (BT*L, BT): batch -> rows broadcast
    P = jnp.asarray(np.ascontiguousarray(sel.T))   # (BT, BT*L): rows -> batch sum

    # ---- weight repack: (Cin, Cout) matmul layout, fold eval-BN scale ------
    we = jnp.transpose(tp["w_expand_t"][:, :, 0]) * tp["bn_expand_scale"][None, :]
    be = tp["bn_expand_shift"][None, :]
    ws = jnp.stack([
        jnp.stack([jnp.transpose(tp["w_stride_t"][k, :, :, j])
                   * tp["bn_stride_scale"][k][None, :] for j in range(3)])
        for k in range(n_blocks)])                                 # (nb,3,C,C)
    bs = tp["bn_stride_shift"][:, None, :]                         # (nb,1,C)
    wm = jnp.stack([jnp.transpose(tp["w_smooth_t"][k, :, :, 0])
                    * tp["bn_smooth_scale"][k][None, :]
                    for k in range(n_blocks)])                     # (nb,C,C)
    bm = tp["bn_smooth_shift"][:, None, :]                         # (nb,1,C)
    wa = jnp.transpose(tp["w_a_t"]); ba = tp["b_a_t"][None, :]
    wb = jnp.transpose(tp["w_b_t"]); bb = tp["b_b_t"][None, :]
    weights = (we, be, ws, bs, wm, bm, wa, ba, wb, bb)

    # ---- specs --------------------------------------------------------------
    def _full_spec(a):
        nd = a.ndim
        return pl.BlockSpec(a.shape, lambda i, _nd=nd: (0,) * _nd)

    grid = (B_pad // b_tile,)
    in_specs = [
        pl.BlockSpec((b_tile * L, Cin), lambda i: (i, 0)),   # x (flattened rows)
        pl.BlockSpec((b_tile, 1), lambda i: (i, 0)),         # 1/sum(mask)
        _full_spec(S), _full_spec(P),
    ]
    for k in range(n_blocks):
        in_specs.append(
            pl.BlockSpec((b_tile * frame_counts[k + 1], 1), lambda i: (i, 0)))
    in_specs += [_full_spec(w) for w in weights]

    # advisory cost estimate for XLA scheduling
    flops = 2 * B_pad * L * Cin * (C + 2 * b_tile)
    for k in range(n_blocks):
        flops += 8 * B_pad * frame_counts[k + 1] * C * C
    flops += 2 * B_pad * C * (C + Cin)
    bytes_accessed = 4 * (x2d.size + invm.size + S.size + P.size
                          + sum(int(mu.size) for mu in mults)
                          + sum(int(w.size) for w in weights) + B_pad * Cin)

    kernel = functools.partial(
        stridenet_kernel, n_blocks=n_blocks, inflation=inflation,
        frame_counts=tuple(frame_counts), b_tile=b_tile)

    out = pl.pallas_call(
        kernel,
        out_shape=jax.ShapeDtypeStruct((B_pad, Cin), jnp.float32),
        grid=grid,
        in_specs=in_specs,
        out_specs=pl.BlockSpec((b_tile, Cin), lambda i: (i, 0)),
        scratch_shapes=[pltpu.VMEM((b_tile * L, C), jnp.float32)],
        compiler_params=pltpu.CompilerParams(
            dimension_semantics=("parallel",)),
        cost_estimate=pl.CostEstimate(
            flops=int(flops), transcendentals=0,
            bytes_accessed=int(bytes_accessed)),
    )(x2d, invm, S, P, *mults, *weights)

    return out[:B].reshape(B, -1, 3)


# ----------------------------------------------------------------------------
# Pure-JAX reference in the original PyTorch (NCL) layout for validation
# ----------------------------------------------------------------------------
def reference_forward(x_ncl, mask_n1l, tp, *, n_blocks, inflation):
    def conv1d(x, w, stride):
        return jax.lax.conv_general_dilated(
            x, w, (stride,), "VALID",
            dimension_numbers=("NCH", "OIH", "NCH"))

    def bn(x, scale, shift):
        return x * scale[None, :, None] + shift[None, :, None]

    B = x_ncl.shape[0]
    mean_x = x_ncl.sum(-1, keepdims=True) / mask_n1l.sum(-1, keepdims=True)
    h = jax.nn.relu(bn(conv1d(x_ncl - mean_x, tp["w_expand_t"], 1),
                       tp["bn_expand_scale"], tp["bn_expand_shift"]))
    mask = mask_n1l
    ones = jnp.ones((1, 1, 3), jnp.float32)
    for k in range(n_blocks):
        res = h[:, :, 1::inflation]
        sx = conv1d(h, tp["w_stride_t"][k], inflation)
        sm = conv1d(mask, ones, inflation)
        mask = (sm != 0).astype(jnp.float32)
        mult = 3.0 / (sm + 1e-6) * mask
        sx = sx * mult
        h = jax.nn.relu(bn(sx, tp["bn_stride_scale"][k], tp["bn_stride_shift"][k]))
        h = jax.nn.relu(bn(conv1d(h, tp["w_smooth_t"][k], 1),
                           tp["bn_smooth_scale"][k], tp["bn_smooth_shift"][k]))
        h = h + res
    h = h[:, :, 0]
    meanf = mean_x[:, :, 0]
    out = jax.nn.relu(h @ tp["w_a_t"].T + tp["b_a_t"]) @ tp["w_b_t"].T \
        + tp["b_b_t"] + meanf
    return out.reshape(B, -1, 3)


# ----------------------------------------------------------------------------
# Deterministic parameter / input construction + run
# ----------------------------------------------------------------------------
def bn_affine(keys, C):
    gamma = 1.0 + 0.1 * jax.random.normal(keys[0], (C,), jnp.float32)
    beta = 0.1 * jax.random.normal(keys[1], (C,), jnp.float32)
    rmean = 0.1 * jax.random.normal(keys[2], (C,), jnp.float32)
    rvar = 1.0 + 0.1 * jax.random.uniform(keys[3], (C,), jnp.float32)
    eps = 1e-5
    scale = gamma / jnp.sqrt(rvar + eps)
    shift = beta - rmean * scale
    return scale, shift


if __name__ == "__main__":
    # small config consistent with the module's forward
    n_joints, channels, n_blocks, inflation = 4, 32, 2, 3
    Cin = n_joints * 3
    B, L = 2, 9                     # 9 -> 3 -> 1 frames over 2 blocks (stride 3)

    key = jax.random.PRNGKey(0)
    ks = jax.random.split(key, 32)

    # --- parameters in the original torch layouts --------------------------
    w_expand_t = 0.1 * jax.random.normal(ks[0], (channels, Cin, 1), jnp.float32)
    w_stride_t = 0.1 * jax.random.normal(ks[1], (n_blocks, channels, channels, 3),
                                         jnp.float32)
    w_smooth_t = 0.1 * jax.random.normal(ks[2], (n_blocks, channels, channels, 1),
                                         jnp.float32)
    w_a_t = 0.01 * jax.random.normal(ks[3], (channels, channels), jnp.float32)
    b_a_t = jnp.zeros((channels,), jnp.float32)          # nn.init.constant_(bias, 0)
    w_b_t = 0.01 * jax.random.normal(ks[4], (Cin, channels), jnp.float32)
    b_b_t = jnp.zeros((Cin,), jnp.float32)

    e_scale, e_shift = bn_affine(jax.random.split(ks[5], 4), channels)
    ss_scale, ss_shift, ms_scale, ms_shift = [], [], [], []
    for k in range(n_blocks):
        sc, sh = bn_affine(jax.random.split(ks[6 + k], 4), channels)
        ss_scale.append(sc); ss_shift.append(sh)
        sc, sh = bn_affine(jax.random.split(ks[10 + k], 4), channels)
        ms_scale.append(sc); ms_shift.append(sh)
    ss_scale = jnp.stack(ss_scale); ss_shift = jnp.stack(ss_shift)
    ms_scale = jnp.stack(ms_scale); ms_shift = jnp.stack(ms_shift)

    torch_params = dict(
        w_expand_t=w_expand_t, w_stride_t=w_stride_t, w_smooth_t=w_smooth_t,
        bn_expand_scale=e_scale, bn_expand_shift=e_shift,
        bn_stride_scale=ss_scale, bn_stride_shift=ss_shift,
        bn_smooth_scale=ms_scale, bn_smooth_shift=ms_shift,
        w_a_t=w_a_t, b_a_t=b_a_t, w_b_t=w_b_t, b_b_t=b_b_t,
    )

    # --- inputs (torch NCL layout) ------------------------------------------
    x_ncl = jax.random.normal(ks[20], (B, Cin, L), jnp.float32)
    mask_n1l = jnp.ones((B, 1, L), jnp.float32)
    mask_n1l = mask_n1l.at[0, 0, L - 1].set(0.0).at[1, 0, 0].set(0.0)

    out = stridenet_forward(x_ncl, mask_n1l, torch_params,
                            n_blocks=n_blocks, inflation=inflation)
    out = jax.block_until_ready(out)

    ref = reference_forward(x_ncl, mask_n1l, torch_params,
                            n_blocks=n_blocks, inflation=inflation)
    ref = jax.block_until_ready(ref)

    assert out.shape == (B, n_joints, 3)
    assert jnp.allclose(out, ref, rtol=1e-4, atol=1e-4), (
        f"max abs err {jnp.max(jnp.abs(out - ref))}")
    print("KERNEL_OK")
</pallas_src>

<mosaic_0001>
module attributes {stable_mosaic.version = 11 : i64} {
  func.func @stridenet_kernel(%arg0: i32, %arg1: memref<18x12xf32, #tpu.memory_space<vmem>>, %arg2: memref<2x1xf32, #tpu.memory_space<vmem>>, %arg3: memref<18x2xf32, #tpu.memory_space<vmem>>, %arg4: memref<2x18xf32, #tpu.memory_space<vmem>>, %arg5: memref<6x1xf32, #tpu.memory_space<vmem>>, %arg6: memref<2x1xf32, #tpu.memory_space<vmem>>, %arg7: memref<12x32xf32, #tpu.memory_space<vmem>>, %arg8: memref<1x32xf32, #tpu.memory_space<vmem>>, %arg9: memref<2x3x32x32xf32, #tpu.memory_space<vmem>>, %arg10: memref<2x1x32xf32, #tpu.memory_space<vmem>>, %arg11: memref<2x32x32xf32, #tpu.memory_space<vmem>>, %arg12: memref<2x1x32xf32, #tpu.memory_space<vmem>>, %arg13: memref<32x32xf32, #tpu.memory_space<vmem>>, %arg14: memref<1x32xf32, #tpu.memory_space<vmem>>, %arg15: memref<32x12xf32, #tpu.memory_space<vmem>>, %arg16: memref<1x12xf32, #tpu.memory_space<vmem>>, %arg17: memref<2x12xf32, #tpu.memory_space<vmem>>, %arg18: memref<18x32xf32, #tpu.memory_space<vmem>>) attributes {dimension_semantics = [#tpu.dimension_semantics<parallel>], iteration_bounds = array<i64: 1>, scalar_prefetch = 0 : i64, scratch_operands = 1 : i64, tpu.core_type = #tpu.core_type<tc>, window_params = [{transform_indices = @transform_0, window_bounds = array<i64: 18, 12>}, {transform_indices = @transform_1, window_bounds = array<i64: 2, 1>}, {pipeline_mode = #tpu.pipeline_mode<synchronous>, transform_indices = @transform_2, window_bounds = array<i64: 18, 2>}, {pipeline_mode = #tpu.pipeline_mode<synchronous>, transform_indices = @transform_3, window_bounds = array<i64: 2, 18>}, {transform_indices = @transform_4, window_bounds = array<i64: 6, 1>}, {transform_indices = @transform_5, window_bounds = array<i64: 2, 1>}, {pipeline_mode = #tpu.pipeline_mode<synchronous>, transform_indices = @transform_6, window_bounds = array<i64: 12, 32>}, {pipeline_mode = #tpu.pipeline_mode<synchronous>, transform_indices = @transform_7, window_bounds = array<i64: 1, 32>}, {pipeline_mode = #tpu.pipeline_mode<synchronous>, transform_indices = @transform_8, window_bounds = array<i64: 2, 3, 32, 32>}, {pipeline_mode = #tpu.pipeline_mode<synchronous>, transform_indices = @transform_9, window_bounds = array<i64: 2, 1, 32>}, {pipeline_mode = #tpu.pipeline_mode<synchronous>, transform_indices = @transform_10, window_bounds = array<i64: 2, 32, 32>}, {pipeline_mode = #tpu.pipeline_mode<synchronous>, transform_indices = @transform_11, window_bounds = array<i64: 2, 1, 32>}, {pipeline_mode = #tpu.pipeline_mode<synchronous>, transform_indices = @transform_12, window_bounds = array<i64: 32, 32>}, {pipeline_mode = #tpu.pipeline_mode<synchronous>, transform_indices = @transform_13, window_bounds = array<i64: 1, 32>}, {pipeline_mode = #tpu.pipeline_mode<synchronous>, transform_indices = @transform_14, window_bounds = array<i64: 32, 12>}, {pipeline_mode = #tpu.pipeline_mode<synchronous>, transform_indices = @transform_15, window_bounds = array<i64: 1, 12>}, {transform_indices = @transform_16, window_bounds = array<i64: 2, 12>}]} {
    %c0 = arith.constant 0 : index
    %c0_0 = arith.constant 0 : index
    %0 = vector.load %arg1[%c0, %c0_0] : memref<18x12xf32, #tpu.memory_space<vmem>>, vector<18x12xf32>
    %c0_1 = arith.constant 0 : index
    %c0_2 = arith.constant 0 : index
    %1 = vector.load %arg4[%c0_1, %c0_2] : memref<2x18xf32, #tpu.memory_space<vmem>>, vector<2x18xf32>
    %cst = arith.constant dense<0.000000e+00> : vector<2x12xf32>
    %2 = tpu.matmul %1, %0, %cst {dimension_numbers = #tpu.dot_dimension_numbers<[1], [0], [0], [1], [0, 0, 1, 1], [], []>} : vector<2x18xf32>, vector<18x12xf32>, vector<2x12xf32> -> vector<2x12xf32>
    %c0_3 = arith.constant 0 : index
    %c0_4 = arith.constant 0 : index
    %3 = vector.load %arg2[%c0_3, %c0_4] : memref<2x1xf32, #tpu.memory_space<vmem>>, vector<2x1xf32>
    %4 = vector.broadcast %3 : vector<2x1xf32> to vector<2x12xf32>
    %5 = arith.mulf %2, %4 : vector<2x12xf32>
    %c0_5 = arith.constant 0 : index
    %c0_6 = arith.constant 0 : index
    %6 = vector.load %arg3[%c0_5, %c0_6] : memref<18x2xf32, #tpu.memory_space<vmem>>, vector<18x2xf32>
    %cst_7 = arith.constant dense<0.000000e+00> : vector<18x12xf32>
    %7 = tpu.matmul %6, %5, %cst_7 {dimension_numbers = #tpu.dot_dimension_numbers<[1], [0], [0], [1], [0, 0, 1, 1], [], []>} : vector<18x2xf32>, vector<2x12xf32>, vector<18x12xf32> -> vector<18x12xf32>
    %8 = arith.subf %0, %7 : vector<18x12xf32>
    %c0_8 = arith.constant 0 : index
    %c0_9 = arith.constant 0 : index
    %9 = vector.load %arg7[%c0_8, %c0_9] : memref<12x32xf32, #tpu.memory_space<vmem>>, vector<12x32xf32>
    %cst_10 = arith.constant dense<0.000000e+00> : vector<18x32xf32>
    %10 = tpu.matmul %8, %9, %cst_10 {dimension_numbers = #tpu.dot_dimension_numbers<[1], [0], [0], [1], [0, 0, 1, 1], [], []>} : vector<18x12xf32>, vector<12x32xf32>, vector<18x32xf32> -> vector<18x32xf32>
    %c0_11 = arith.constant 0 : index
    %c0_12 = arith.constant 0 : index
    %11 = vector.load %arg8[%c0_11, %c0_12] : memref<1x32xf32, #tpu.memory_space<vmem>>, vector<1x32xf32>
    %12 = vector.broadcast %11 : vector<1x32xf32> to vector<18x32xf32>
    %13 = arith.addf %10, %12 : vector<18x32xf32>
    %cst_13 = arith.constant 0.000000e+00 : f32
    %14 = vector.broadcast %cst_13 : f32 to vector<18x32xf32>
    %15 = arith.maximumf %13, %14 : vector<18x32xf32>
    %c0_14 = arith.constant 0 : index
    %c0_15 = arith.constant 0 : index
    %16 = vector.load %arg18[%c0_14, %c0_15] : memref<18x32xf32, #tpu.memory_space<vmem>>, vector<18x32xf32>
    tpu.vector_store %arg18[%c0_14, %c0_15], %15 {strides = array<i32>} : memref<18x32xf32, #tpu.memory_space<vmem>>, vector<18x32xf32>,
    %c0_16 = arith.constant 0 : index
    %c0_17 = arith.constant 0 : index
    %17 = tpu.strided_load %arg18[%c0_16, %c0_17] {strides = array<i32: 3, 1>} : memref<18x32xf32, #tpu.memory_space<vmem>>, vector<6x32xf32>
    %c1 = arith.constant 1 : index
    %c0_18 = arith.constant 0 : index
    %18 = tpu.strided_load %arg18[%c1, %c0_18] {strides = array<i32: 3, 1>} : memref<18x32xf32, #tpu.memory_space<vmem>>, vector<6x32xf32>
    %c2 = arith.constant 2 : index
    %c0_19 = arith.constant 0 : index
    %19 = tpu.strided_load %arg18[%c2, %c0_19] {strides = array<i32: 3, 1>} : memref<18x32xf32, #tpu.memory_space<vmem>>, vector<6x32xf32>
    %c0_20 = arith.constant 0 : index
    %c0_21 = arith.constant 0 : index
    %c0_22 = arith.constant 0 : index
    %c0_23 = arith.constant 0 : index
    %20 = vector.load %arg9[%c0_20, %c0_21, %c0_22, %c0_23] : memref<2x3x32x32xf32, #tpu.memory_space<vmem>>, vector<1x1x32x32xf32>
    %21 = vector.shape_cast %20 : vector<1x1x32x32xf32> to vector<32x32xf32>
    %cst_24 = arith.constant dense<0.000000e+00> : vector<6x32xf32>
    %22 = tpu.matmul %17, %21, %cst_24 {dimension_numbers = #tpu.dot_dimension_numbers<[1], [0], [0], [1], [0, 0, 1, 1], [], []>} : vector<6x32xf32>, vector<32x32xf32>, vector<6x32xf32> -> vector<6x32xf32>
    %c0_25 = arith.constant 0 : index
    %c1_26 = arith.constant 1 : index
    %c0_27 = arith.constant 0 : index
    %c0_28 = arith.constant 0 : index
    %23 = vector.load %arg9[%c0_25, %c1_26, %c0_27, %c0_28] : memref<2x3x32x32xf32, #tpu.memory_space<vmem>>, vector<1x1x32x32xf32>
    %24 = vector.shape_cast %23 : vector<1x1x32x32xf32> to vector<32x32xf32>
    %cst_29 = arith.constant dense<0.000000e+00> : vector<6x32xf32>
    %25 = tpu.matmul %18, %24, %cst_29 {dimension_numbers = #tpu.dot_dimension_numbers<[1], [0], [0], [1], [0, 0, 1, 1], [], []>} : vector<6x32xf32>, vector<32x32xf32>, vector<6x32xf32> -> vector<6x32xf32>
    %26 = arith.addf %22, %25 : vector<6x32xf32>
    %c0_30 = arith.constant 0 : index
    %c2_31 = arith.constant 2 : index
    %c0_32 = arith.constant 0 : index
    %c0_33 = arith.constant 0 : index
    %27 = vector.load %arg9[%c0_30, %c2_31, %c0_32, %c0_33] : memref<2x3x32x32xf32, #tpu.memory_space<vmem>>, vector<1x1x32x32xf32>
    %28 = vector.shape_cast %27 : vector<1x1x32x32xf32> to vector<32x32xf32>
    %cst_34 = arith.constant dense<0.000000e+00> : vector<6x32xf32>
    %29 = tpu.matmul %19, %28, %cst_34 {dimension_numbers = #tpu.dot_dimension_numbers<[1], [0], [0], [1], [0, 0, 1, 1], [], []>} : vector<6x32xf32>, vector<32x32xf32>, vector<6x32xf32> -> vector<6x32xf32>
    %30 = arith.addf %26, %29 : vector<6x32xf32>
    %c0_35 = arith.constant 0 : index
    %c0_36 = arith.constant 0 : index
    %31 = vector.load %arg5[%c0_35, %c0_36] : memref<6x1xf32, #tpu.memory_space<vmem>>, vector<6x1xf32>
    %32 = vector.broadcast %31 : vector<6x1xf32> to vector<6x32xf32>
    %33 = arith.mulf %30, %32 : vector<6x32xf32>
    %c0_37 = arith.constant 0 : index
    %c0_38 = arith.constant 0 : index
    %c0_39 = arith.constant 0 : index
    %34 = vector.load %arg10[%c0_37, %c0_38, %c0_39] : memref<2x1x32xf32, #tpu.memory_space<vmem>>, vector<1x1x32xf32>
    %35 = vector.shape_cast %34 : vector<1x1x32xf32> to vector<1x32xf32>
    %36 = vector.broadcast %35 : vector<1x32xf32> to vector<6x32xf32>
    %37 = arith.addf %33, %36 : vector<6x32xf32>
    %cst_40 = arith.constant 0.000000e+00 : f32
    %38 = vector.broadcast %cst_40 : f32 to vector<6x32xf32>
    %39 = arith.maximumf %37, %38 : vector<6x32xf32>
    %c0_41 = arith.constant 0 : index
    %c0_42 = arith.constant 0 : index
    %c0_43 = arith.constant 0 : index
    %40 = vector.load %arg11[%c0_41, %c0_42, %c0_43] : memref<2x32x32xf32, #tpu.memory_space<vmem>>, vector<1x32x32xf32>
    %41 = vector.shape_cast %40 : vector<1x32x32xf32> to vector<32x32xf32>
    %cst_44 = arith.constant dense<0.000000e+00> : vector<6x32xf32>
    %42 = tpu.matmul %39, %41, %cst_44 {dimension_numbers = #tpu.dot_dimension_numbers<[1], [0], [0], [1], [0, 0, 1, 1], [], []>} : vector<6x32xf32>, vector<32x32xf32>, vector<6x32xf32> -> vector<6x32xf32>
    %c0_45 = arith.constant 0 : index
    %c0_46 = arith.constant 0 : index
    %c0_47 = arith.constant 0 : index
    %43 = vector.load %arg12[%c0_45, %c0_46, %c0_47] : memref<2x1x32xf32, #tpu.memory_space<vmem>>, vector<1x1x32xf32>
    %44 = vector.shape_cast %43 : vector<1x1x32xf32> to vector<1x32xf32>
    %45 = vector.broadcast %44 : vector<1x32xf32> to vector<6x32xf32>
    %46 = arith.addf %42, %45 : vector<6x32xf32>
    %cst_48 = arith.constant 0.000000e+00 : f32
    %47 = vector.broadcast %cst_48 : f32 to vector<6x32xf32>
    %48 = arith.maximumf %46, %47 : vector<6x32xf32>
    %49 = arith.addf %48, %18 : vector<6x32xf32>
    %c0_49 = arith.constant 0 : index
    %c0_50 = arith.constant 0 : index
    %50 = vector.load %arg18[%c0_49, %c0_50] : memref<18x32xf32, #tpu.memory_space<vmem>>, vector<6x32xf32>
    tpu.vector_store %arg18[%c0_49, %c0_50], %49 {strides = array<i32>} : memref<18x32xf32, #tpu.memory_space<vmem>>, vector<6x32xf32>,
    %c0_51 = arith.constant 0 : index
    %c0_52 = arith.constant 0 : index
    %51 = tpu.strided_load %arg18[%c0_51, %c0_52] {strides = array<i32: 3, 1>} : memref<18x32xf32, #tpu.memory_space<vmem>>, vector<2x32xf32>
    %c1_53 = arith.constant 1 : index
    %c0_54 = arith.constant 0 : index
    %52 = tpu.strided_load %arg18[%c1_53, %c0_54] {strides = array<i32: 3, 1>} : memref<18x32xf32, #tpu.memory_space<vmem>>, vector<2x32xf32>
    %c2_55 = arith.constant 2 : index
    %c0_56 = arith.constant 0 : index
    %53 = tpu.strided_load %arg18[%c2_55, %c0_56] {strides = array<i32: 3, 1>} : memref<18x32xf32, #tpu.memory_space<vmem>>, vector<2x32xf32>
    %c1_57 = arith.constant 1 : index
    %c0_58 = arith.constant 0 : index
    %c0_59 = arith.constant 0 : index
    %c0_60 = arith.constant 0 : index
    %54 = vector.load %arg9[%c1_57, %c0_58, %c0_59, %c0_60] : memref<2x3x32x32xf32, #tpu.memory_space<vmem>>, vector<1x1x32x32xf32>
    %55 = vector.shape_cast %54 : vector<1x1x32x32xf32> to vector<32x32xf32>
    %cst_61 = arith.constant dense<0.000000e+00> : vector<2x32xf32>
    %56 = tpu.matmul %51, %55, %cst_61 {dimension_numbers = #tpu.dot_dimension_numbers<[1], [0], [0], [1], [0, 0, 1, 1], [], []>} : vector<2x32xf32>, vector<32x32xf32>, vector<2x32xf32> -> vector<2x32xf32>
    %c1_62 = arith.constant 1 : index
    %c1_63 = arith.constant 1 : index
    %c0_64 = arith.constant 0 : index
    %c0_65 = arith.constant 0 : index
    %57 = vector.load %arg9[%c1_62, %c1_63, %c0_64, %c0_65] : memref<2x3x32x32xf32, #tpu.memory_space<vmem>>, vector<1x1x32x32xf32>
    %58 = vector.shape_cast %57 : vector<1x1x32x32xf32> to vector<32x32xf32>
    %cst_66 = arith.constant dense<0.000000e+00> : vector<2x32xf32>
    %59 = tpu.matmul %52, %58, %cst_66 {dimension_numbers = #tpu.dot_dimension_numbers<[1], [0], [0], [1], [0, 0, 1, 1], [], []>} : vector<2x32xf32>, vector<32x32xf32>, vector<2x32xf32> -> vector<2x32xf32>
    %60 = arith.addf %56, %59 : vector<2x32xf32>
    %c1_67 = arith.constant 1 : index
    %c2_68 = arith.constant 2 : index
    %c0_69 = arith.constant 0 : index
    %c0_70 = arith.constant 0 : index
    %61 = vector.load %arg9[%c1_67, %c2_68, %c0_69, %c0_70] : memref<2x3x32x32xf32, #tpu.memory_space<vmem>>, vector<1x1x32x32xf32>
    %62 = vector.shape_cast %61 : vector<1x1x32x32xf32> to vector<32x32xf32>
    %cst_71 = arith.constant dense<0.000000e+00> : vector<2x32xf32>
    %63 = tpu.matmul %53, %62, %cst_71 {dimension_numbers = #tpu.dot_dimension_numbers<[1], [0], [0], [1], [0, 0, 1, 1], [], []>} : vector<2x32xf32>, vector<32x32xf32>, vector<2x32xf32> -> vector<2x32xf32>
    %64 = arith.addf %60, %63 : vector<2x32xf32>
    %c0_72 = arith.constant 0 : index
    %c0_73 = arith.constant 0 : index
    %65 = vector.load %arg6[%c0_72, %c0_73] : memref<2x1xf32, #tpu.memory_space<vmem>>, vector<2x1xf32>
    %66 = vector.broadcast %65 : vector<2x1xf32> to vector<2x32xf32>
    %67 = arith.mulf %64, %66 : vector<2x32xf32>
    %c1_74 = arith.constant 1 : index
    %c0_75 = arith.constant 0 : index
    %c0_76 = arith.constant 0 : index
    %68 = vector.load %arg10[%c1_74, %c0_75, %c0_76] : memref<2x1x32xf32, #tpu.memory_space<vmem>>, vector<1x1x32xf32>
    %69 = vector.shape_cast %68 : vector<1x1x32xf32> to vector<1x32xf32>
    %70 = vector.broadcast %69 : vector<1x32xf32> to vector<2x32xf32>
    %71 = arith.addf %67, %70 : vector<2x32xf32>
    %cst_77 = arith.constant 0.000000e+00 : f32
    %72 = vector.broadcast %cst_77 : f32 to vector<2x32xf32>
    %73 = arith.maximumf %71, %72 : vector<2x32xf32>
    %c1_78 = arith.constant 1 : index
    %c0_79 = arith.constant 0 : index
    %c0_80 = arith.constant 0 : index
    %74 = vector.load %arg11[%c1_78, %c0_79, %c0_80] : memref<2x32x32xf32, #tpu.memory_space<vmem>>, vector<1x32x32xf32>
    %75 = vector.shape_cast %74 : vector<1x32x32xf32> to vector<32x32xf32>
    %cst_81 = arith.constant dense<0.000000e+00> : vector<2x32xf32>
    %76 = tpu.matmul %73, %75, %cst_81 {dimension_numbers = #tpu.dot_dimension_numbers<[1], [0], [0], [1], [0, 0, 1, 1], [], []>} : vector<2x32xf32>, vector<32x32xf32>, vector<2x32xf32> -> vector<2x32xf32>
    %c1_82 = arith.constant 1 : index
    %c0_83 = arith.constant 0 : index
    %c0_84 = arith.constant 0 : index
    %77 = vector.load %arg12[%c1_82, %c0_83, %c0_84] : memref<2x1x32xf32, #tpu.memory_space<vmem>>, vector<1x1x32xf32>
    %78 = vector.shape_cast %77 : vector<1x1x32xf32> to vector<1x32xf32>
    %79 = vector.broadcast %78 : vector<1x32xf32> to vector<2x32xf32>
    %80 = arith.addf %76, %79 : vector<2x32xf32>
    %cst_85 = arith.constant 0.000000e+00 : f32
    %81 = vector.broadcast %cst_85 : f32 to vector<2x32xf32>
    %82 = arith.maximumf %80, %81 : vector<2x32xf32>
    %83 = arith.addf %82, %52 : vector<2x32xf32>
    %c0_86 = arith.constant 0 : index
    %c0_87 = arith.constant 0 : index
    %84 = vector.load %arg18[%c0_86, %c0_87] : memref<18x32xf32, #tpu.memory_space<vmem>>, vector<2x32xf32>
    tpu.vector_store %arg18[%c0_86, %c0_87], %83 {strides = array<i32>} : memref<18x32xf32, #tpu.memory_space<vmem>>, vector<2x32xf32>,
    %c0_88 = arith.constant 0 : index
    %c0_89 = arith.constant 0 : index
    %85 = vector.load %arg13[%c0_88, %c0_89] : memref<32x32xf32, #tpu.memory_space<vmem>>, vector<32x32xf32>
    %cst_90 = arith.constant dense<0.000000e+00> : vector<2x32xf32>
    %86 = tpu.matmul %83, %85, %cst_90 {dimension_numbers = #tpu.dot_dimension_numbers<[1], [0], [0], [1], [0, 0, 1, 1], [], []>} : vector<2x32xf32>, vector<32x32xf32>, vector<2x32xf32> -> vector<2x32xf32>
    %c0_91 = arith.constant 0 : index
    %c0_92 = arith.constant 0 : index
    %87 = vector.load %arg14[%c0_91, %c0_92] : memref<1x32xf32, #tpu.memory_space<vmem>>, vector<1x32xf32>
    %88 = vector.broadcast %87 : vector<1x32xf32> to vector<2x32xf32>
    %89 = arith.addf %86, %88 : vector<2x32xf32>
    %cst_93 = arith.constant 0.000000e+00 : f32
    %90 = vector.broadcast %cst_93 : f32 to vector<2x32xf32>
    %91 = arith.maximumf %89, %90 : vector<2x32xf32>
    %c0_94 = arith.constant 0 : index
    %c0_95 = arith.constant 0 : index
    %92 = vector.load %arg15[%c0_94, %c0_95] : memref<32x12xf32, #tpu.memory_space<vmem>>, vector<32x12xf32>
    %cst_96 = arith.constant dense<0.000000e+00> : vector<2x12xf32>
    %93 = tpu.matmul %91, %92, %cst_96 {dimension_numbers = #tpu.dot_dimension_numbers<[1], [0], [0], [1], [0, 0, 1, 1], [], []>} : vector<2x32xf32>, vector<32x12xf32>, vector<2x12xf32> -> vector<2x12xf32>
    %c0_97 = arith.constant 0 : index
    %c0_98 = arith.constant 0 : index
    %94 = vector.load %arg16[%c0_97, %c0_98] : memref<1x12xf32, #tpu.memory_space<vmem>>, vector<1x12xf32>
    %95 = vector.broadcast %94 : vector<1x12xf32> to vector<2x12xf32>
    %96 = arith.addf %93, %95 : vector<2x12xf32>
    %97 = arith.addf %96, %5 : vector<2x12xf32>
    %c0_99 = arith.constant 0 : index
    %c0_100 = arith.constant 0 : index
    %98 = vector.load %arg17[%c0_99, %c0_100] : memref<2x12xf32, #tpu.memory_space<vmem>>, vector<2x12xf32>
    tpu.vector_store %arg17[%c0_99, %c0_100], %97 {strides = array<i32>} : memref<2x12xf32, #tpu.memory_space<vmem>>, vector<2x12xf32>,
    return
  }
  func.func @transform_0(%arg0: i32) -> (i32, i32) {
    %c0_i32 = arith.constant 0 : i32
    %c0_i32_0 = arith.constant 0 : i32
    return %arg0, %c0_i32 : i32, i32
  }
  func.func @transform_1(%arg0: i32) -> (i32, i32) {
    %c0_i32 = arith.constant 0 : i32
    %c0_i32_0 = arith.constant 0 : i32
    return %arg0, %c0_i32 : i32, i32
  }
  func.func @transform_2(%arg0: i32) -> (i32, i32) {
    %c0_i32 = arith.constant 0 : i32
    %c0_i32_0 = arith.constant 0 : i32
    %c0_i32_1 = arith.constant 0 : i32
    return %c0_i32, %c0_i32_0 : i32, i32
  }
  func.func @transform_3(%arg0: i32) -> (i32, i32) {
    %c0_i32 = arith.constant 0 : i32
    %c0_i32_0 = arith.constant 0 : i32
    %c0_i32_1 = arith.constant 0 : i32
    return %c0_i32, %c0_i32_0 : i32, i32
  }
  func.func @transform_4(%arg0: i32) -> (i32, i32) {
    %c0_i32 = arith.constant 0 : i32
    %c0_i32_0 = arith.constant 0 : i32
    return %arg0, %c0_i32 : i32, i32
  }
  func.func @transform_5(%arg0: i32) -> (i32, i32) {
    %c0_i32 = arith.constant 0 : i32
    %c0_i32_0 = arith.constant 0 : i32
    return %arg0, %c0_i32 : i32, i32
  }
  func.func @transform_6(%arg0: i32) -> (i32, i32) {
    %c0_i32 = arith.constant 0 : i32
    %c0_i32_0 = arith.constant 0 : i32
    %c0_i32_1 = arith.constant 0 : i32
    return %c0_i32, %c0_i32_0 : i32, i32
  }
  func.func @transform_7(%arg0: i32) -> (i32, i32) {
    %c0_i32 = arith.constant 0 : i32
    %c0_i32_0 = arith.constant 0 : i32
    %c0_i32_1 = arith.constant 0 : i32
    return %c0_i32, %c0_i32_0 : i32, i32
  }
  func.func @transform_8(%arg0: i32) -> (i32, i32, i32, i32) {
    %c0_i32 = arith.constant 0 : i32
    %c0_i32_0 = arith.constant 0 : i32
    %c0_i32_1 = arith.constant 0 : i32
    %c0_i32_2 = arith.constant 0 : i32
    %c0_i32_3 = arith.constant 0 : i32
    return %c0_i32, %c0_i32_0, %c0_i32_1, %c0_i32_2 : i32, i32, i32, i32
  }
  func.func @transform_9(%arg0: i32) -> (i32, i32, i32) {
    %c0_i32 = arith.constant 0 : i32
    %c0_i32_0 = arith.constant 0 : i32
    %c0_i32_1 = arith.constant 0 : i32
    %c0_i32_2 = arith.constant 0 : i32
    return %c0_i32, %c0_i32_0, %c0_i32_1 : i32, i32, i32
  }
  func.func @transform_10(%arg0: i32) -> (i32, i32, i32) {
    %c0_i32 = arith.constant 0 : i32
    %c0_i32_0 = arith.constant 0 : i32
    %c0_i32_1 = arith.constant 0 : i32
    %c0_i32_2 = arith.constant 0 : i32
    return %c0_i32, %c0_i32_0, %c0_i32_1 : i32, i32, i32
  }
  func.func @transform_11(%arg0: i32) -> (i32, i32, i32) {
    %c0_i32 = arith.constant 0 : i32
    %c0_i32_0 = arith.constant 0 : i32
    %c0_i32_1 = arith.constant 0 : i32
    %c0_i32_2 = arith.constant 0 : i32
    return %c0_i32, %c0_i32_0, %c0_i32_1 : i32, i32, i32
  }
  func.func @transform_12(%arg0: i32) -> (i32, i32) {
    %c0_i32 = arith.constant 0 : i32
    %c0_i32_0 = arith.constant 0 : i32
    %c0_i32_1 = arith.constant 0 : i32
    return %c0_i32, %c0_i32_0 : i32, i32
  }
  func.func @transform_13(%arg0: i32) -> (i32, i32) {
    %c0_i32 = arith.constant 0 : i32
    %c0_i32_0 = arith.constant 0 : i32
    %c0_i32_1 = arith.constant 0 : i32
    return %c0_i32, %c0_i32_0 : i32, i32
  }
  func.func @transform_14(%arg0: i32) -> (i32, i32) {
    %c0_i32 = arith.constant 0 : i32
    %c0_i32_0 = arith.constant 0 : i32
    %c0_i32_1 = arith.constant 0 : i32
    return %c0_i32, %c0_i32_0 : i32, i32
  }
  func.func @transform_15(%arg0: i32) -> (i32, i32) {
    %c0_i32 = arith.constant 0 : i32
    %c0_i32_0 = arith.constant 0 : i32
    %c0_i32_1 = arith.constant 0 : i32
    return %c0_i32, %c0_i32_0 : i32, i32
  }
  func.func @transform_16(%arg0: i32) -> (i32, i32) {
    %c0_i32 = arith.constant 0 : i32
    %c0_i32_0 = arith.constant 0 : i32
    return %arg0, %c0_i32 : i32, i32
  }
}

</mosaic_0001>

<bundles_post_ra>
// kernel: tpu_custom_call.1
= control target key start
LH: loop header
LB: loop body
LE: loop exit
PB: predicated region body
PF: predicated region fallthrough
CT: control target
= control target key end

     0   :  { %s1915_s0 = inlined_call_operand.vmem [shape: f32[18,12], index: 0, kind: input, shape index: {}]   ;;  %s1916_s1 = inlined_call_operand.vmem [shape: f32[2,1], index: 1, kind: input, shape index: {}]   ;;  %s1917_s2 = inlined_call_operand.vmem [shape: f32[18,2], index: 2, kind: input, shape index: {}]   ;;  %s1918_s3 = inlined_call_operand.vmem [shape: f32[2,18], index: 3, kind: input, shape index: {}]   ;;  %s1919_s4 = inlined_call_operand.vmem [shape: f32[6,1], index: 4, kind: input, shape index: {}]   ;;  %s1920_s5 = inlined_call_operand.vmem [shape: f32[2,1], index: 5, kind: input, shape index: {}]   ;;  %s1921_s6 = inlined_call_operand.vmem [shape: f32[12,32], index: 6, kind: input, shape index: {}]   ;;  %s1922_s7 = inlined_call_operand.vmem [shape: f32[1,32], index: 7, kind: input, shape index: {}]   ;;  %s1923_s8 = inlined_call_operand.hbm [shape: f32[2,3,32,32], index: 8, kind: input, shape index: {}]   ;;  %s1924_s9 = inlined_call_operand.vmem [shape: f32[2,1,32], index: 9, kind: input, shape index: {}]   ;;  %s1925_s10 = inlined_call_operand.vmem [shape: f32[2,32,32], index: 10, kind: input, shape index: {}]   ;;  %s1926_s11 = inlined_call_operand.vmem [shape: f32[2,1,32], index: 11, kind: input, shape index: {}]   ;;  %s1927_s12 = inlined_call_operand.vmem [shape: f32[32,32], index: 12, kind: input, shape index: {}]   ;;  %s1928_s13 = inlined_call_operand.vmem [shape: f32[1,32], index: 13, kind: input, shape index: {}]   ;;  %s1929_s14 = inlined_call_operand.vmem [shape: f32[32,12], index: 14, kind: input, shape index: {}]   ;;  %s1930_s15 = inlined_call_operand.vmem [shape: f32[1,12], index: 15, kind: input, shape index: {}]   ;;  %s1931_s16 = inlined_call_operand.hbm [shape: f32[2,12], index: 16, kind: output, shape index: {}]  }
   0x1   :  { %1933 = sst [smem:[#allocation9_spill]] %s1915_s0 }
   0x2   :  { %21 = vsyncpa [#allocation4], 0 }
   0x3   :  { %22 = vsyncpa [#allocation5], 0  ;;  %s1614_s21 = smov [#allocation3]   ;;  %s1566_s25 = scalar_lea.hbm %s1923_s8, 3072 }
   0x4   :  { %s44_s22 = sshll.u32 %s1614_s21, 4  ;;  %p1567_p0 = scmp.ne.s32.totalorder %s1923_s8, %s1566_s25  ;;  %s45_s22 = int_to_ptr.vmem [resolvable:$true] %s44_s22 }
   0x5   :  { %p1570_p1 = scmp.lt.u32.totalorder %s1566_s25, %s1923_s8 }
   0x7   :  { %p1572_p2 = pnand %p1570_p1, %p1567_p0 }
   0x9   :  { %1575 = shalt.err (!%p1572_p2)
}
   0xa   :  { %s1576_s30 = scalar_lea.vmem %s45_s22, 3072  ;;  %p1581_p4 = scmp.lt.s32.totalorder %s45_s22, %s45_s22 }
   0xb   :  { %p1577_p3 = scmp.ne.s32.totalorder %s45_s22, %s1576_s30  ;;  %p1582_p5 = scmp.lt.s32.totalorder %s1576_s30, %s1576_s30 }
   0xd   :  { %p1583_p6 = por %p1582_p5, %p1581_p4 }
   0xf   :  { %p1584_p7 = pnand %p1583_p6, %p1577_p3 }
  0x11   :  { %1587 = shalt.err (!%p1584_p7)
}
  0x12   :  { %s1615_s0 = smov 128   ;;  %s1616_s17 = smov 8  }
  0x13   :  { %50 = dma.hbm_to_vmem [thread:$0]  %s1923_s8, 3072, %s45_s22, [#allocation4], %s1615_s0, %s1615_s0, %s1616_s17  }
  0x14   :  { %1610 = dma.done.wait [#allocation4], 3072  }
  0x15   :  { %1611 = vsyncadd [#allocation4], 4294964224  ;;  %v1617_v0 = vmov 0.0|0.0   ;;  %vm1618_vm0 = vmmov 0   ;;  %v1619_v1 = vmov 0.0   ;;  %v1620_v2 = vmov 0  }
  0x16   :  { %1480 = vmatprep.subr.bf16.mxu0 %v1617_v0  ;;  %1343 = vmatprep.mubr.msk.f32.mxu0 %vm1618_vm0, %v1619_v1  ;;  %s1934_s21 = sld [smem:[#allocation9_spill]]  ;;  %v150_v6 = vld [vmem:[%s1916_s1] sm:$0x3]  ;;  %vm76_vm1 = vcmask 1041408   ;;  %vm72_vm2 = vcmask 146432   ;;  %vm275_vm3 = vcmask 1043456  }
  0x17   :  { %1564 = vset.pattern.permute.xlu0 %v1620_v2  ;;  %1346 = vmatprep.subr.mxu1 %v1619_v1  ;;  %v606_v7 = vld [vmem:[%s1919_s4] sm:$0x3f]  ;;  %v257_v11 = vld [vmem:[%s1921_s6 + $0x8] sm:$0xf]  ;;  %vm1621_vm4 = vmmov 1   ;;  %vm160_vm6 = vcmask 15360  }
  0x18   :  { %1348 = vmatprep.mubr.msk.f32.mxu1 %vm1618_vm0, %v1619_v1  ;;  %1565 = vset.pattern.permute.xlu1 %v1620_v2  ;;  %v71_v9 = vld [vmem:[%s1918_s3] sm:$0x3]  ;;  %vm1485_vm5 = vmpackc.low %vm275_vm3, %vm1621_vm4  ;;  %v158_v18 = vld [vmem:[%s1917_s2 + $0x8] sm:$0xff]  ;;  %vm265_vm7 = vcmask 97280   ;;  %vm362_vm8 = vcmask 261120   ;;  %vm365_vm9 = vcmask 254976  }
  0x19   :  { %153 = vperm.xlu0 %1564, %v150_v6   ;;  %v256_v10 = vld [vmem:[%s1921_s6] sm:$0xff]  ;;  %v159_v19 = vld [vmem:[%s1917_s2 + $0x10] sm:$0x3]  ;;  %v377_v29 = vld [vmem:[#allocation3 + $0x20] sm:$0xff]  ;;  %vm708_vm10 = vcmask 259072   ;;  %s1622_s8 = smov [#allocation6]  }
  0x1a   :  { %v1484_v12 = vpack.c.bf16 %v257_v11, %v256_v10  ;;  %v157_v17 = vld [vmem:[%s1917_s2] sm:$0xff]  ;;  %v379_v32 = vld [vmem:[#allocation3 + $0x30] sm:$0xff]  ;;  %v380_v33 = vld [vmem:[#allocation3 + $0x38] sm:$0xff]  ;;  %vm1224_vm11 = vcmask 91136  }
  0x1b   :  { %v378_v30 = vld [vmem:[#allocation3 + $0x28] sm:$0xff]  ;;  %v1491_v34 = vpack.c.bf16 %v380_v33, %v379_v32  ;;  %v623_v36 = vld [vmem:[%s1925_s10 + $0x8] sm:$0xff]  ;;  %v372_v51 = vld [vmem:[#allocation3] sm:$0xff] }
  0x1c   :  { %v68_v3 = vld [vmem:[%s1934_s21] sm:$0xff]  ;;  %v69_v4 = vld [vmem:[%s1934_s21 + $0x8] sm:$0xff]  ;;  %v70_v8 = vld [vmem:[%s1934_s21 + $0x10] sm:$0x3]  ;;  %v1488_v31 = vpack.c.bf16 %v378_v30, %v377_v29  ;;  %s1232_s21 = sshll.u32 %s1622_s8, 4  ;;  %s1233_s21 = int_to_ptr.vmem [resolvable:$true] %s1232_s21 }
  0x1d   :  { %v1481_v5 = vpack.c.bf16 %v69_v4, %v68_v3  ;;  %609 = vperm.xlu0 %1564, %v606_v7   ;;  %v622_v35 = vld [vmem:[%s1925_s10] sm:$0xff]  ;;  %v374_v54 = vld [vmem:[#allocation3 + $0x10] sm:$0xff]  ;;  %v375_v55 = vld [vmem:[#allocation3 + $0x18] sm:$0xff]  ;;  %p1593_p9 = scmp.lt.s32.totalorder %s1233_s21, %s1233_s21 }
  0x1e   :  { %v1506_v37 = vpack.c.bf16 %v623_v36, %v622_v35  ;;  %v1247_v38 = vld [vmem:[%s1922_s7] ss:$0 sm:$0xff]  ;;  %v1497_v57 = vpack.c.bf16 %v375_v55, %v374_v54  ;;  %v528_v58 = vld [vmem:[#allocation3 + $0x40] sm:$0xff]  ;;  %v530_v61 = vld [vmem:[#allocation3 + $0x50] sm:$0xff] }
  0x1f   :  { %1482 = vmatpush3.bf16.msra.mxu0 %v1481_v5  ;;  %v373_v52 = vld [vmem:[#allocation3 + $0x8] sm:$0xff]  ;;  %v531_v62 = vld [vmem:[#allocation3 + $0x58] sm:$0xff]  ;;  %v625_v5 = vld [vmem:[%s1925_s10 + $0x18] sm:$0xff] }
  0x20   :  { %1341 = vmatprep.subr.mxu0 %v1619_v1  ;;  %v1494_v53 = vpack.c.bf16 %v373_v52, %v372_v51  ;;  %v529_v59 = vld [vmem:[#allocation3 + $0x48] sm:$0xff]  ;;  %v1503_v2 = vpack.c.bf16 %v531_v62, %v530_v61  ;;  %v717_v32 = vld [vmem:[#allocation3 + $0x78] sm:$0xff]  ;;  %v870_v35 = vld [vmem:[#allocation3 + $0xa0] sm:$0xff] }
  0x21   :  { %v1500_v60 = vpack.c.bf16 %v529_v59, %v528_v58  ;;  %v715_v29 = vld [vmem:[#allocation3 + $0x68] sm:$0xff]  ;;  %v1056_v59 = vld [vmem:[%s1927_s12 + $0x10] sm:$0xff]  ;;  %v1140_v62 = vld [vmem:[%s1929_s14 + $0x8] sm:$0xff] }
  0x22   :  { %v871_v36 = vld [vmem:[#allocation3 + $0xa8] sm:$0xff] }
  0x23   :  { %1342 = vmatpush3.msk.msra.mxu0 %vm76_vm1, %v70_v8  ;;  %v1262_v51 = vld [vmem:[%s1924_s9 + $0x1] ss:$0 sm:$0xff] }
  0x24   :  { %1344 = vmatmul.mubr.msk.f32.vlgmr.msra.gmra.mrb[0].mxu0 %vm72_vm2, %v71_v9  ;;  %1483 = vmatprep.subr.bf16.mxu0 %v1617_v0  ;;  %v1255_v9 = vld [vmem:[%s1924_s9] ss:$0 sm:$0xff] }
  0x25   :  { %1361 = vmatprep.mubr.msk.f32.mxu0 %vm1618_vm0, %v1619_v1  ;;  %1486 = vmatpush3.bf16.msk.msra.mxu0 %vm1485_vm5, %v1484_v12  ;;  %v1139_v61 = vld [vmem:[%s1929_s14] sm:$0xff] }
  0x26   :  { %1505 = vmatprep.subr.bf16.mxu0 %v1617_v0 }
  0x98   :  { %v154_v13 = vpop.permute.xlu0 %153 }
  0x9c   :  { %v610_v7 = vpop.permute.xlu0 %609 }
  0xf7   :  { %v146_v14 = vpop.f32.mrb[0].mxu0 }
  0xf8   :  { %v1756_v15 = vmul.f32 %v154_v13, %v146_v14  ;;  %v1345_v16 = vpop.f32.mrb[1].mxu0  ;;  %v719_v14 = vld [vmem:[#allocation3 + $0x80] sm:$0xff] }
  0xf9   :  { %v720_v16 = vld [vmem:[#allocation3 + $0x88] sm:$0xff] }
  0xfa   :  { %1347 = vmatpush3.msk.msra.mxu1 %vm76_vm1, %v1756_v15 }
  0xfb   :  { %1349 = vmatmul.mubr.msk.f32.vlgmr.msra.gmra.mrb[0].mxu1 %vm160_vm6, %v157_v17  ;;  %1487 = vmatprep.subr.bf16.mxu1 %v1617_v0  ;;  %v1512_v17 = vpack.c.bf16 %v720_v16, %v719_v14  ;;  %v1272_v16 = vld [vmem:[%s1930_s15] ss:$0 sm:$0xff] }
  0xfc   :  { %1351 = vmatprep.mubr.msk.f32.mxu1 %vm1618_vm0, %v1619_v1  ;;  %1489 = vmatpush3.bf16.msra.mxu1 %v1488_v31  ;;  %v716_v31 = vld [vmem:[#allocation3 + $0x70] sm:$0xff] }
  0xfd   :  { %1490 = vmatprep.subr.bf16.mxu1 %v1617_v0 }
  0xff   :  { %1352 = vmatmul.mubr.msk.f32.gmra.mrb[2].mxu1 %vm160_vm6, %v158_v18  ;;  %v721_v18 = vld [vmem:[#allocation3 + $0x90] sm:$0xff] }
 0x100   :  { %1354 = vmatprep.mubr.msk.f32.mxu1 %vm1618_vm0, %v1619_v1  ;;  %1492 = vmatpush3.bf16.msra.mxu1 %v1491_v34  ;;  %v1521_v34 = vpack.c.bf16 %v717_v32, %v716_v31 }
 0x101   :  { %1493 = vmatprep.subr.bf16.mxu1 %v1617_v0 }
 0x103   :  { %1355 = vmatmul.mubr.msk.f32.gmra.mrb[4].mxu1 %vm160_vm6, %v159_v19  ;;  %v722_v19 = vld [vmem:[#allocation3 + $0x98] sm:$0xff] }
 0x104   :  { %1378 = vmatprep.mubr.msk.f32.mxu1 %vm1618_vm0, %v1619_v1 }
 0x1ce   :  { %v239_v20 = vpop.f32.mrb[0].mxu1 }
 0x1cf   :  { %v253_v21 = vsub.f32 %v68_v3, %v239_v20  ;;  %v1350_v22 = vpop.f32.mrb[1].mxu1  ;;  %v1515_v20 = vpack.c.bf16 %v722_v19, %v721_v18 }
 0x1d0   :  { %v1256_v22 = vld [vmem:[%s1926_s11] ss:$0 sm:$0xff] }
 0x1d1   :  { %1362 = vmatmul.mubr.msk.f32.vlgmr.msra.gmra.mrb[2].mxu0 %vm265_vm7, %v253_v21  ;;  %v948_v21 = vld [vmem:[%s1920_s5] sm:$0x3] }
 0x1d2   :  { %v244_v23 = vpop.f32.mrb[2].mxu1  ;;  %1364 = vmatprep.mubr.msk.f32.mxu0 %vm1618_vm0, %v1619_v1  ;;  %1507 = vmatpush3.bf16.msra.mxu0 %v1506_v37  ;;  %v1524_v37 = vpack.c.bf16 %v871_v36, %v870_v35 }
 0x1d3   :  { %v254_v24 = vsub.f32 %v69_v4, %v244_v23  ;;  %v1353_v25 = vpop.f32.mrb[3].mxu1  ;;  %1508 = vmatprep.subr.bf16.mxu0 %v1617_v0  ;;  %v624_v4 = vld [vmem:[%s1925_s10 + $0x10] sm:$0xff]  ;;  %951 = vperm.xlu1 %1565, %v948_v21  }
 0x1d4   :  { %v1509_v6 = vpack.c.bf16 %v625_v5, %v624_v4 }
 0x1d5   :  { %1365 = vmatmul.mubr.msk.f32.gmra.mrb[4].mxu0 %vm265_vm7, %v254_v24 }
 0x1d6   :  { %v249_v26 = vpop.f32.mrb[4].mxu1  ;;  %1367 = vmatprep.mubr.msk.f32.mxu0 %vm1618_vm0, %v1619_v1  ;;  %1510 = vmatpush3.bf16.msra.mxu0 %v1509_v6 }
 0x1d7   :  { %v255_v27 = vsub.f32 %v70_v8, %v249_v26  ;;  %v1356_v28 = vpop.f32.mrb[5].mxu1  ;;  %1511 = vmatprep.subr.bf16.mxu0 %v1617_v0 }
 0x1d8   :  { %v714_v28 = vld [vmem:[#allocation3 + $0x60] sm:$0xff] }
 0x1d9   :  { %1368 = vmatmul.mubr.msk.f32.gmra.mrb[6].mxu0 %vm265_vm7, %v255_v27  ;;  %v1518_v30 = vpack.c.bf16 %v715_v29, %v714_v28 }
 0x1da   :  { %1411 = vmatprep.mubr.msk.f32.mxu0 %vm1618_vm0, %v1619_v1 }
 0x2a4   :  { %v345_v39 = vpop.f32.mrb[2].mxu0 }
 0x2a5   :  { %v346_v40 = vadd.f32 %v1247_v38, %v345_v39  ;;  %v1363_v41 = vpop.f32.mrb[3].mxu0  ;;  %v873_v39 = vld [vmem:[#allocation3 + $0xb8] sm:$0xff] }
 0x2a7   :  { %v359_v42 = vmax.f32 %v346_v40, 0.0 }
 0x2a8   :  { %v350_v43 = vpop.f32.mrb[4].mxu0 }
 0x2a9   :  { %363 = vst.msk [vmem:[#allocation2] sm:$0xff] %vm362_vm8, %v359_v42  ;;  %v351_v44 = vadd.f32 %v1247_v38, %v350_v43  ;;  %v1366_v45 = vpop.f32.mrb[5].mxu0  ;;  %v1263_v43 = vld [vmem:[%s1925_s10 + $0x20] sm:$0xff] }
 0x2ab   :  { %v360_v46 = vmax.f32 %v351_v44, 0.0  ;;  %v1264_v44 = vld [vmem:[%s1925_s10 + $0x28] sm:$0xff] }
 0x2ac   :  { %v355_v47 = vpop.f32.mrb[6].mxu0  ;;  %v1530_v45 = vpack.c.bf16 %v1264_v44, %v1263_v43 }
 0x2ad   :  { %364 = vst.msk [vmem:[#allocation2 + $0x8] sm:$0xff] %vm362_vm8, %v360_v46  ;;  %v356_v48 = vadd.f32 %v1247_v38, %v355_v47  ;;  %v1369_v49 = vpop.f32.mrb[7].mxu0  ;;  %v872_v38 = vld [vmem:[#allocation3 + $0xb0] sm:$0xff]  ;;  %v1265_v46 = vld [vmem:[%s1925_s10 + $0x30] sm:$0xff]  ;;  %v1266_v47 = vld [vmem:[%s1925_s10 + $0x38] sm:$0xff] }
 0x2ae   :  { %v1527_v41 = vpack.c.bf16 %v873_v39, %v872_v38  ;;  %v952_v49 = vpop.permute.xlu1 %951 }
 0x2af   :  { %v361_v50 = vmax.f32 %v356_v48, 0.0  ;;  %v1533_v48 = vpack.c.bf16 %v1266_v47, %v1265_v46 }
 0x2b1   :  { %366 = vst.msk [vmem:[#allocation2 + $0x10] sm:$0x3] %vm365_vm9, %v361_v50 }
 0x2b4   :  { %v367_v63 = vld [vmem:[#allocation2] ss:$3 sm:$0x3f] }
 0x2b8   :  { %v369_v56 = vld [vmem:[#allocation2 + $0x1] ss:$3 sm:$0x3f]  ;;  %v371_v3 = vld [vmem:[#allocation2 + $0x2] ss:$3 sm:$0x3f] }
 0x2b9   :  { %1379 = vmatmul.mubr.msk.f32.vlgmr.msra.gmra.mrb[6].mxu1 %vm362_vm8, %v369_v56 }
 0x2ba   :  { %1495 = vmatpush3.bf16.msra.mxu1 %v1494_v53  ;;  %1389 = vmatprep.mubr.msk.f32.mxu1 %vm1618_vm0, %v1619_v1 }
 0x2bb   :  { %1496 = vmatprep.subr.bf16.mxu1 %v1617_v0 }
 0x2be   :  { %1498 = vmatpush3.bf16.msra.mxu1 %v1497_v57  ;;  %v1055_v57 = vld [vmem:[%s1927_s12 + $0x8] sm:$0xff] }
 0x2bf   :  { %1499 = vmatprep.subr.bf16.mxu1 %v1617_v0 }
 0x2c1   :  { %1390 = vmatmul.mubr.msk.f32.vlgmr.msra.gmra.mrb[6].mxu1 %vm362_vm8, %v367_v63  ;;  %v1542_v63 = vpack.c.bf16 %v1140_v62, %v1139_v61 }
 0x2c2   :  { %1501 = vmatpush3.bf16.msra.mxu1 %v1500_v60  ;;  %1400 = vmatprep.mubr.msk.f32.mxu1 %vm1618_vm0, %v1619_v1 }
 0x2c3   :  { %1502 = vmatprep.subr.bf16.mxu1 %v1617_v0 }
 0x2c6   :  { %1504 = vmatpush3.bf16.msra.mxu1 %v1503_v2  ;;  %v1268_v2 = vld [vmem:[%s1926_s11 + $0x1] ss:$0 sm:$0xff] }
 0x2c7   :  { %1529 = vmatprep.subr.bf16.mxu1 %v1617_v0 }
 0x2c9   :  { %1401 = vmatmul.mubr.msk.f32.vlgmr.msra.gmra.mrb[6].mxu1 %vm362_vm8, %v371_v3 }
 0x2ca   :  { %1455 = vmatprep.mubr.msk.f32.mxu1 %vm1618_vm0, %v1619_v1  ;;  %1531 = vmatpush3.bf16.msra.mxu1 %v1530_v45 }
 0x2cb   :  { %1532 = vmatprep.subr.bf16.mxu1 %v1617_v0 }
 0x2ce   :  { %1534 = vmatpush3.bf16.msra.mxu1 %v1533_v48 }
 0x2cf   :  { %1535 = vmatprep.subr.bf16.mxu1 %v1617_v0 }
 0x39c   :  { %v601_v8 = vpop.f32.mrb[6].mxu1 }
 0x39d   :  { %v612_v10 = vmul.f32 %v610_v7, %v601_v8  ;;  %v1402_v11 = vpop.f32.mrb[7].mxu1  ;;  %v1141_v8 = vld [vmem:[%s1929_s14 + $0x10] sm:$0xff] }
 0x39f   :  { %v620_v12 = vadd.f32 %v1255_v9, %v612_v10  ;;  %v1270_v10 = vld [vmem:[%s1928_s13] ss:$0 sm:$0xff]  ;;  %s1588_s13 = scalar_lea.vmem %s1233_s21, 32 }
 0x3a0   :  { %p1589_p8 = scmp.ne.s32.totalorder %s1233_s21, %s1588_s13  ;;  %p1594_p10 = scmp.lt.s32.totalorder %s1588_s13, %s1588_s13 }
 0x3a1   :  { %v621_v13 = vmax.f32 %v620_v12, 0.0 }
 0x3a2   :  { %p1595_p11 = por %p1594_p10, %p1593_p9 }
 0x3a3   :  { %1412 = vmatmul.mubr.msk.f32.vlgmr.msra.gmra.mrb[8].mxu0 %vm362_vm8, %v621_v13 }
 0x3a4   :  { %1422 = vmatprep.mubr.msk.f32.mxu0 %vm1618_vm0, %v1619_v1  ;;  %1513 = vmatpush3.bf16.msra.mxu0 %v1512_v17  ;;  %p1596_p12 = pnand %p1595_p11, %p1589_p8 }
 0x3a5   :  { %1514 = vmatprep.subr.bf16.mxu0 %v1617_v0 }
 0x3a8   :  { %1516 = vmatpush3.bf16.msra.mxu0 %v1515_v20 }
 0x3a9   :  { %1517 = vmatprep.subr.bf16.mxu0 %v1617_v0 }
 0x476   :  { %v702_v23 = vpop.f32.mrb[8].mxu0 }
 0x477   :  { %v703_v24 = vadd.f32 %v1256_v22, %v702_v23  ;;  %v1413_v25 = vpop.f32.mrb[9].mxu0 }
 0x479   :  { %v706_v26 = vmax.f32 %v703_v24, 0.0 }
 0x47b   :  { %v707_v27 = vadd.f32 %v706_v26, %v369_v56  ;;  %v1054_v56 = vld [vmem:[%s1927_s12] sm:$0xff] }
 0x47c   :  { %v1536_v58 = vpack.c.bf16 %v1055_v57, %v1054_v56 }
 0x47d   :  { %709 = vst.msk [vmem:[#allocation2] sm:$0x3f] %vm708_vm10, %v707_v27 }
 0x484   :  { %v711_v33 = vld [vmem:[#allocation2 + $0x1] ss:$3 sm:$0x3]  ;;  %v710_v40 = vld [vmem:[#allocation2] ss:$3 sm:$0x3] }
 0x485   :  { %1423 = vmatmul.mubr.msk.f32.vlgmr.msra.gmra.mrb[10].mxu0 %vm362_vm8, %v711_v33  ;;  %v712_v42 = vld [vmem:[#allocation2 + $0x2] ss:$3 sm:$0x3] }
 0x486   :  { %1519 = vmatpush3.bf16.msra.mxu0 %v1518_v30  ;;  %1433 = vmatprep.mubr.msk.f32.mxu0 %vm1618_vm0, %v1619_v1 }
 0x487   :  { %1520 = vmatprep.subr.bf16.mxu0 %v1617_v0 }
 0x48a   :  { %1522 = vmatpush3.bf16.msra.mxu0 %v1521_v34 }
 0x48b   :  { %1523 = vmatprep.subr.bf16.mxu0 %v1617_v0 }
 0x48d   :  { %1434 = vmatmul.mubr.msk.f32.vlgmr.msra.gmra.mrb[10].mxu0 %vm362_vm8, %v710_v40 }
 0x48e   :  { %1525 = vmatpush3.bf16.msra.mxu0 %v1524_v37  ;;  %1444 = vmatprep.mubr.msk.f32.mxu0 %vm1618_vm0, %v1619_v1 }
 0x48f   :  { %1526 = vmatprep.subr.bf16.mxu0 %v1617_v0 }
 0x492   :  { %1528 = vmatpush3.bf16.msra.mxu0 %v1527_v41 }
 0x493   :  { %1541 = vmatprep.subr.bf16.mxu0 %v1617_v0 }
 0x495   :  { %1445 = vmatmul.mubr.msk.f32.vlgmr.msra.gmra.mrb[10].mxu0 %vm362_vm8, %v712_v42 }
 0x496   :  { %1477 = vmatprep.mubr.msk.f32.mxu0 %vm1618_vm0, %v1619_v1  ;;  %1543 = vmatpush3.bf16.msra.mxu0 %v1542_v63 }
 0x497   :  { %1544 = vmatprep.subr.bf16.mxu0 %v1617_v0 }
 0x568   :  { %v943_v50 = vpop.f32.mrb[10].mxu0 }
 0x569   :  { %v954_v52 = vmul.f32 %v952_v49, %v943_v50  ;;  %v1446_v53 = vpop.f32.mrb[11].mxu0 }
 0x56b   :  { %v963_v54 = vadd.f32 %v1262_v51, %v954_v52 }
 0x56d   :  { %v964_v55 = vmax.f32 %v963_v54, 0.0 }
 0x56f   :  { %1456 = vmatmul.mubr.msk.f32.vlgmr.msra.gmra.mrb[8].mxu1 %vm362_vm8, %v964_v55 }
 0x570   :  { %1466 = vmatprep.mubr.msk.f32.mxu1 %vm1618_vm0, %v1619_v1  ;;  %1537 = vmatpush3.bf16.msra.mxu1 %v1536_v58  ;;  %v1057_v1 = vld [vmem:[%s1927_s12 + $0x18] sm:$0xff] }
 0x571   :  { %1538 = vmatprep.subr.bf16.mxu1 %v1617_v0  ;;  %v1539_v60 = vpack.c.bf16 %v1057_v1, %v1056_v59  ;;  %v1142_v0 = vld [vmem:[%s1929_s14 + $0x18] sm:$0xff] }
 0x572   :  { %v1545_v9 = vpack.c.bf16 %v1142_v0, %v1141_v8 }
 0x574   :  { %1540 = vmatpush3.bf16.msra.mxu1 %v1539_v60  ;;  %1546 = vmatpush3.bf16.msra.mxu0 %v1545_v9 }
 0x642   :  { %v1047_v3 = vpop.f32.mrb[8].mxu1 }
 0x643   :  { %v1048_v4 = vadd.f32 %v1268_v2, %v1047_v3  ;;  %v1457_v5 = vpop.f32.mrb[9].mxu1 }
 0x645   :  { %v1051_v6 = vmax.f32 %v1048_v4, 0.0 }
 0x647   :  { %v1052_v7 = vadd.f32 %v1051_v6, %v711_v33 }
 0x649   :  { %1053 = vst.msk [vmem:[#allocation2] sm:$0x3] %vm365_vm9, %v1052_v7  ;;  %1467 = vmatmul.mubr.msk.f32.vlgmr.msra.gmra.mrb[10].mxu1 %vm362_vm8, %v1052_v7 }
 0x71c   :  { %v1134_v11 = vpop.f32.mrb[10].mxu1 }
 0x71d   :  { %v1135_v12 = vadd.f32 %v1270_v10, %v1134_v11  ;;  %v1468_v13 = vpop.f32.mrb[11].mxu1 }
 0x71f   :  { %v1138_v14 = vmax.f32 %v1135_v12, 0.0 }
 0x721   :  { %1478 = vmatmul.mubr.msk.f32.vlgmr.msra.gmra.mrb[12].mxu0 %vm362_vm8, %v1138_v14 }
 0x7f4   :  { %v1219_v17 = vpop.f32.mrb[12].mxu0 }
 0x7f5   :  { %v1220_v18 = vadd.f32 %v1272_v16, %v1219_v17  ;;  %v1479_v19 = vpop.f32.mrb[13].mxu0 }
 0x7f7   :  { %v1223_v20 = vadd.f32 %v1220_v18, %v1756_v15 }
 0x7f9   :  { %1225 = vst.msk [vmem:[#allocation6] sm:$0x3] %vm1224_vm11, %v1223_v20 }
 0x7fa   :  { %1599 = shalt.err (!%p1596_p12)
}
 0x7fb   :  { %s1600_s15 = scalar_lea.hbm %s1931_s16, 32 }
 0x7fc   :  { %p1601_p13 = scmp.ne.s32.totalorder %s1931_s16, %s1600_s15  ;;  %p1604_p0 = scmp.lt.u32.totalorder %s1600_s15, %s1931_s16 }
 0x7fe   :  { %p1606_p1 = pnand %p1604_p0, %p1601_p13 }
 0x800   :  { %1609 = shalt.err (!%p1606_p1)
}
 0x801   :  { %1235 = dma.vmem_to_hbm [thread:$0]  %s1233_s21, 32, %s1931_s16, [#allocation5]  }
 0x802   :  { %1612 = dma.done.wait [#allocation5], 32  }
 0x803   :  { %1613 = vsyncadd [#allocation5], 4294967264 }
 0x804   :  { %1239 = vsyncpa [#allocation4], 1 }
 0x805   :  { %1240 = vsyncpa [#allocation5], 1 }

</bundles_post_ra>
